<compile_context>
chip_gen: v7x
topology: tpu7x:2x2x1
jax: 0.10.0
libtpu: 0.0.40
codegen_flags: <defaults>
</compile_context>

<pallas_src>
import math

import jax
import jax.numpy as jnp
from jax.experimental import pallas as pl
from jax.experimental.pallas import tpu as pltpu

_LANES = 128  # vreg lane width — same on v5e / v6e / v7x


def _copy_kernel(x_ref, o_ref):
    # Identity copy of the current lane-dense tile (unmasked full-lane vst).
    o_ref[...] = x_ref[...]


def input_block_forward(x: jax.Array) -> jax.Array:
    """InputBlock.forward == nn.Identity. Optimal lowering: no kernel, no copy."""
    return x


def input_block_forward_pallas(x: jax.Array) -> jax.Array:
    """Identity through an explicit Pallas kernel boundary."""
    total = math.prod(x.shape)
    if total % _LANES != 0:
        # Identity is exact; padding a pure identity just to get a lane-dense
        # view would be strictly worse than returning x.
        return x

    rows = total // _LANES
    x2d = x.reshape(rows, _LANES)

    # Row tile: multiple of 8 sublanes, <= 1024 rows. A (1024, 128) f32 tile is
    # 0.5 MiB; with double-buffered in + out (4 live buffers) this stays far
    # under v7x's 64 MiB physical VMEM and v5e's 16 MiB scoped default.
    row_tile = rows
    if rows > 1024:
        for cand in (1024, 512, 256, 128, 64, 32, 16, 8):
            if rows % cand == 0:
                row_tile = cand
                break
    grid = (rows // row_tile,)

    y2d = pl.pallas_call(
        _copy_kernel,
        out_shape=jax.ShapeDtypeStruct(x2d.shape, x2d.dtype),
        grid=grid,
        in_specs=[pl.BlockSpec((row_tile, _LANES), lambda i: (i, 0))],
        out_specs=pl.BlockSpec((row_tile, _LANES), lambda i: (i, 0)),
        # Output aliases the input buffer: no separate output allocation.
        input_output_aliases={0: 0},
        compiler_params=pltpu.CompilerParams(
            # Shards the row grid across v7x's 2 TensorCores; harmless no-op
            # on v5e/v6e (1 TC).
            dimension_semantics=("parallel",),
            # Explicit budget so tiles compile on v5e's 16 MiB scoped default
            # while leaving headroom on v7x's 64 MiB physical VMEM.
            vmem_limit_bytes=48 * 1024 * 1024,
        ),
    )(x2d)

    return y2d.reshape(x.shape)


if __name__ == "__main__":
    key = jax.random.PRNGKey(0)
    # NCHW, consistent with a PyTorch conv-style input block.
    x = jax.random.normal(key, (2, 4, 16, 16), dtype=jnp.float32)

    # Optimal path (what InputBlock should actually lower to).
    y_fast = input_block_forward(x)

    # Pallas kernel-boundary path (2*4*16*16 = 2048 elems -> (16, 128) tile).
    y = jax.jit(input_block_forward_pallas)(x)
    y = jax.block_until_ready(y)

    assert y.shape == x.shape and y.dtype == x.dtype
    assert bool(jnp.all(y == x))
    assert bool(jnp.all(y_fast == x))
    print("KERNEL_OK")
</pallas_src>

<mosaic_0001>
module attributes {stable_mosaic.version = 11 : i64} {
  func.func @_copy_kernel(%arg0: i32, %arg1: memref<16x128xf32, #tpu.memory_space<vmem>>, %arg2: memref<16x128xf32, #tpu.memory_space<vmem>>) attributes {dimension_semantics = [#tpu.dimension_semantics<parallel>], iteration_bounds = array<i64: 1>, scalar_prefetch = 0 : i64, scratch_operands = 0 : i64, tpu.core_type = #tpu.core_type<tc>, window_params = [{transform_indices = @transform_0, window_bounds = array<i64: 16, 128>}, {transform_indices = @transform_1, window_bounds = array<i64: 16, 128>}]} {
    %c0 = arith.constant 0 : index
    %c0_0 = arith.constant 0 : index
    %0 = vector.load %arg1[%c0, %c0_0] : memref<16x128xf32, #tpu.memory_space<vmem>>, vector<16x128xf32>
    %c0_1 = arith.constant 0 : index
    %c0_2 = arith.constant 0 : index
    %1 = vector.load %arg2[%c0_1, %c0_2] : memref<16x128xf32, #tpu.memory_space<vmem>>, vector<16x128xf32>
    tpu.vector_store %arg2[%c0_1, %c0_2], %0 {strides = array<i32>} : memref<16x128xf32, #tpu.memory_space<vmem>>, vector<16x128xf32>,
    return
  }
  func.func @transform_0(%arg0: i32) -> (i32, i32) {
    %c0_i32 = arith.constant 0 : i32
    %c0_i32_0 = arith.constant 0 : i32
    return %arg0, %c0_i32 : i32, i32
  }
  func.func @transform_1(%arg0: i32) -> (i32, i32) {
    %c0_i32 = arith.constant 0 : i32
    %c0_i32_0 = arith.constant 0 : i32
    return %arg0, %c0_i32 : i32, i32
  }
}

</mosaic_0001>

<bundles_post_ra>
// kernel: input_block_forward_pallas.1
= control target key start
LH: loop header
LB: loop body
LE: loop exit
PB: predicated region body
PF: predicated region fallthrough
CT: control target
= control target key end

     0   :  { %s38_s0 = inlined_call_operand.vmem [shape: f32[16,128], index: 0, kind: input, shape index: {}, may-alias: {0,1}]   ;;  %s39_s1 = inlined_call_operand.vmem [shape: f32[16,128], index: 1, kind: output, shape index: {}, may-alias: {0,1}]  }
   0x1   :  { %v8_v0 = vld [vmem:[%s38_s0] sm:$0xff]  ;;  %v9_v1 = vld [vmem:[%s38_s0 + $0x8] sm:$0xff] }
   0x2   :  { %10 = vst [vmem:[%s39_s1] sm:$0xff] %v8_v0  ;;  %11 = vst [vmem:[%s39_s1 + $0x8] sm:$0xff] %v9_v1 }

</bundles_post_ra>
